<compile_context>
chip_gen: v5e
topology: v5e:2x2
jax: 0.10.0
libtpu: 0.0.40
codegen_flags: <defaults>
</compile_context>

<pallas_src>
import jax
import jax.numpy as jnp
from jax.experimental import pallas as pl
from jax.experimental.pallas import tpu as pltpu


# --------------------------------------------------------------------------- #
# Kernel: one (tm, *) pixel tile per grid step.
# --------------------------------------------------------------------------- #
def deup_cat_kernel(x_ref, prev_ref, w_eff_ref, w3p_ref, b_eff_ref, out_ref):
    # x_ref:     (tm, Cin)
    # prev_ref:  (tm, 4*Cout)  taps (kh,kw) packed lane-dense along channels
    # w_eff_ref: (Cin, 4*Cout) folded w1 @ wt[k] @ w3y, taps stacked on out dim
    # w3p_ref:   (Cout, Cout)  conv3 weight slice acting on `prev`
    # b_eff_ref: (1, 4*Cout)   folded bias (f32)
    # out_ref:   (tm, 4*Cout)
    cout = w3p_ref.shape[0]
    acc = jnp.dot(x_ref[...], w_eff_ref[...], preferred_element_type=jnp.float32)
    acc = acc + b_eff_ref[...]
    w3p = w3p_ref[...]
    prev = prev_ref[...]
    # Per-tap (tm,Cout)x(Cout,Cout) dots replace the old block-diagonal
    # (tm,4Cout)x(4Cout,4Cout) matmul (75% zero FLOPs).  For Cout a multiple of
    # 128 each lane slice / store below is tile-aligned (no relayout, unmasked
    # vst); for tiny Cout (demo) the sizes are trivially small anyway.
    for k in range(4):
        lo = k * cout
        tap = jnp.dot(prev[:, lo:lo + cout], w3p,
                      preferred_element_type=jnp.float32)
        out_ref[:, lo:lo + cout] = (acc[:, lo:lo + cout] + tap).astype(out_ref.dtype)


# --------------------------------------------------------------------------- #
# Generation-aware VMEM budgets (chooser budget, compiler vmem limit).
# --------------------------------------------------------------------------- #
def _vmem_budgets():
    try:
        cap = int(pltpu.get_tpu_info().vmem_capacity_bytes)
    except Exception:
        cap = 64 << 20          # conservative (v7x-sized) fallback
    if cap <= (64 << 20):
        # v7x: leave headroom for Mosaic internal scratch / dot temporaries.
        return int(cap * 0.60), int(cap * 0.85)
    # v5e / v6e: 128 MiB per TensorCore — use most of it.
    return int(cap * 0.75), int(cap * 0.85)


# --------------------------------------------------------------------------- #
# Tile-size chooser: largest step-aligned divisor of M that fits the budget and
# gives >= min_steps grid steps (>= 2 per v7x TensorCore).  If no aligned
# divisor exists, return a capped tile and let the wrapper pad M.
# --------------------------------------------------------------------------- #
def _choose_tm(M, Cin, c4, bpe, *, budget_bytes, min_steps=4, tm_max=2048,
               step=8):
    cout = c4 // 4
    # Resident weights: W_eff (Cin,C4) + w3p (Cout,Cout) in compute dtype
    # (single-buffered via pl.Buffered(1)) + b_eff (1,C4) in f32.
    weight_bytes = bpe * (Cin * c4 + cout * cout) + 4 * c4
    # Per pixel-row: double-buffered x / prev / out tiles + ~2x f32 (tm,C4)
    # dot temporaries (accumulator is not double-buffered but not free either).
    per_row = 2 * bpe * (Cin + 2 * c4) + 8 * c4
    cap = (budget_bytes - weight_bytes) // per_row
    cap = int(min(cap, tm_max, M))
    cap -= cap % step
    cap = max(cap, step)

    best = None          # largest divisor with >= min_steps grid steps
    best_any = None      # largest divisor at all
    for d in range(step, cap + 1, step):
        if M % d:
            continue
        best_any = d
        if (M // d) >= min_steps:
            best = d
    if best is not None:
        return best
    if best_any is not None:
        return best_any
    return cap           # no aligned divisor: caller pads M up to multiple of tm


# --------------------------------------------------------------------------- #
# Fused core on channels-last, tap-packed activations (no layout glue).
# --------------------------------------------------------------------------- #
def deup_cat_packed(x_m, prev_packed, w_eff, w3p, b_eff, *, tm=None,
                    out_dtype=None, single_buffer_weights=True):
    """x_m: (M, Cin); prev_packed: (M, 4*Cout) taps packed lane-dense.
    Returns packed (M, 4*Cout) output taps."""
    M, Cin = x_m.shape
    C4 = prev_packed.shape[1]
    Cout = C4 // 4
    compute_dtype = x_m.dtype
    if out_dtype is None:
        out_dtype = compute_dtype
    bpe = jnp.dtype(compute_dtype).itemsize
    step = {1: 32, 2: 16}.get(bpe, 8)   # sublane packing granularity per dtype

    budget, vmem_limit = _vmem_budgets()
    if tm is None:
        tm = _choose_tm(M, Cin, C4, bpe, budget_bytes=budget, step=step)

    # Awkward N*H*W: pad to a multiple of tm (padded rows discarded below).
    Mp = -(-M // tm) * tm
    if Mp != M:
        x_m = jnp.pad(x_m, ((0, Mp - M), (0, 0)))
        prev_packed = jnp.pad(prev_packed, ((0, Mp - M), (0, 0)))

    resident = (dict(pipeline_mode=pl.Buffered(1))
                if single_buffer_weights else {})

    out_r = pl.pallas_call(
        deup_cat_kernel,
        out_shape=jax.ShapeDtypeStruct((Mp, C4), out_dtype),
        grid_spec=pltpu.PrefetchScalarGridSpec(
            num_scalar_prefetch=0,
            grid=(Mp // tm,),
            in_specs=[
                pl.BlockSpec((tm, Cin), lambda i: (i, 0)),              # x tile
                pl.BlockSpec((tm, C4), lambda i: (i, 0)),               # prev tile
                pl.BlockSpec((Cin, C4), lambda i: (0, 0), **resident),  # W_eff
                pl.BlockSpec((Cout, Cout), lambda i: (0, 0), **resident),  # w3p
                pl.BlockSpec((1, C4), lambda i: (0, 0), **resident),    # b_eff
            ],
            out_specs=pl.BlockSpec((tm, C4), lambda i: (i, 0)),
        ),
        compiler_params=pltpu.CompilerParams(
            dimension_semantics=("parallel",),
            vmem_limit_bytes=vmem_limit,
        ),
    )(x_m, prev_packed, w_eff.astype(compute_dtype),
      w3p.astype(compute_dtype), b_eff.astype(jnp.float32))

    return out_r[:M] if Mp != M else out_r


# --------------------------------------------------------------------------- #
# Host-side algebraic weight folding.
# --------------------------------------------------------------------------- #
def _fold_weights(params):
    w1, b1, wt, bt, w3, b3 = (params["w1"], params["b1"], params["wt"],
                              params["bt"], params["w3"], params["b3"])
    Cin, Cout = w1.shape
    w3p = w3[:Cout]          # conv3 slice acting on `prev` (concat comes first)
    w3y = w3[Cout:]          # conv3 slice acting on the upsampled path
    # W_eff[:, k*Cout:(k+1)*Cout] = w1 @ wt[k] @ w3y
    w_eff = jnp.einsum("ia,kab,bo->iko", w1, wt, w3y).reshape(Cin, 4 * Cout)
    # b_eff[k] = (b1 @ wt[k] + bt) @ w3y + b3
    b_eff = ((jnp.einsum("a,kab->kb", b1, wt) + bt[None, :]) @ w3y
             + b3[None, :]).reshape(1, 4 * Cout)
    return w_eff, w3p, b_eff


# --------------------------------------------------------------------------- #
# PyTorch-compatible NCHW wrapper.
# --------------------------------------------------------------------------- #
def deup_cat_forward(x, prev, params, *, tm=None, compute_dtype=jnp.bfloat16,
                     out_dtype=None):
    """x: (N, Cin, H, W);  prev: (N, Cout, 2H, 2W).  Returns (N, Cout, 2H, 2W)."""
    N, Cin, H, W = x.shape
    Cout = params["w1"].shape[1]
    C4 = 4 * Cout
    M = N * H * W
    assert prev.shape == (N, Cout, 2 * H, 2 * W)
    if out_dtype is None:
        out_dtype = compute_dtype

    w_eff, w3p, b_eff = _fold_weights(params)

    # Layout glue for the NCHW interface.
    # TODO(synk): channels-last pipelines should call deup_cat_packed() with
    # x_m / prev_packed directly and keep the output packed — these transposes
    # are extra HBM passes, not compute.
    x_m = jnp.transpose(x, (0, 2, 3, 1)).reshape(M, Cin).astype(compute_dtype)
    prev_packed = (jnp.transpose(prev, (0, 2, 3, 1))     # (N, 2H, 2W, C)
                   .reshape(N, H, 2, W, 2, Cout)         # (N, H, kh, W, kw, C)
                   .transpose(0, 1, 3, 2, 4, 5)          # (N, H, W, kh, kw, C)
                   .reshape(M, C4)
                   .astype(compute_dtype))

    out_r = deup_cat_packed(x_m, prev_packed, w_eff, w3p, b_eff,
                            tm=tm, out_dtype=out_dtype)

    out = (out_r.reshape(N, H, W, 2, 2, Cout)            # (N, H, W, kh, kw, C)
           .transpose(0, 5, 1, 3, 2, 4)                  # (N, C, H, kh, W, kw)
           .reshape(N, Cout, 2 * H, 2 * W))
    return out


# --------------------------------------------------------------------------- #
# Parameter init (mirrors the PyTorch module's weight shapes, flattened for the
# per-pixel matmul formulation).
# --------------------------------------------------------------------------- #
def init_params(key, in_channels, out_channels):
    k1, k2, k3, k4, k5, k6 = jax.random.split(key, 6)
    scale = 0.1
    # conv1: PyTorch (Cout, Cin, 1, 1) -> (Cin, Cout)
    w1 = scale * jax.random.normal(k1, (in_channels, out_channels), jnp.float32)
    b1 = scale * jax.random.normal(k2, (out_channels,), jnp.float32)
    # conv2 (transposed): PyTorch (Cout, Cout, 2, 2) -> (4, Cout, Cout), tap k = kh*2+kw
    wt = scale * jax.random.normal(k3, (4, out_channels, out_channels), jnp.float32)
    bt = scale * jax.random.normal(k4, (out_channels,), jnp.float32)
    # conv3: PyTorch (Cout, 2*Cout, 1, 1) -> (2*Cout, Cout)
    w3 = scale * jax.random.normal(k5, (2 * out_channels, out_channels), jnp.float32)
    b3 = scale * jax.random.normal(k6, (out_channels,), jnp.float32)
    return dict(w1=w1, b1=b1, wt=wt, bt=bt, w3=w3, b3=b3)


# --------------------------------------------------------------------------- #
# Pure-JAX reference mirroring the PyTorch module (NCHW, unfused).
# --------------------------------------------------------------------------- #
def reference_forward(x, prev, params):
    w1, b1, wt, bt, w3, b3 = (params["w1"], params["b1"], params["wt"],
                              params["bt"], params["w3"], params["b3"])
    N, Cin, H, W = x.shape
    Cout = w1.shape[1]
    x1 = jnp.einsum("nchw,cd->ndhw", x, w1) + b1[None, :, None, None]
    y = jnp.zeros((N, Cout, 2 * H, 2 * W), jnp.float32)
    for kh in range(2):
        for kw in range(2):
            tap = (jnp.einsum("nchw,cd->ndhw", x1, wt[kh * 2 + kw])
                   + bt[None, :, None, None])
            y = y.at[:, :, kh::2, kw::2].set(tap)
    cat = jnp.concatenate([prev, y], axis=1)
    out = jnp.einsum("nchw,cd->ndhw", cat, w3) + b3[None, :, None, None]
    return out


if __name__ == "__main__":
    N, Cin, Cout, H, W = 2, 8, 4, 16, 16
    key = jax.random.PRNGKey(0)
    kx, kp, kw = jax.random.split(key, 3)
    x = jax.random.normal(kx, (N, Cin, H, W), jnp.float32)
    prev = jax.random.normal(kp, (N, Cout, 2 * H, 2 * W), jnp.float32)
    params = init_params(kw, Cin, Cout)

    ref = reference_forward(x, prev, params)

    # f32 compute path — tight numerical check.
    out_f32 = jax.block_until_ready(
        deup_cat_forward(x, prev, params, compute_dtype=jnp.float32))
    assert out_f32.shape == (N, Cout, 2 * H, 2 * W)
    assert jnp.allclose(out_f32, ref, atol=1e-4, rtol=1e-4), "f32 mismatch vs reference"

    # Default path (bf16 MXU inputs, f32 accumulation) — loose check.
    out_bf16 = jax.block_until_ready(deup_cat_forward(x, prev, params))
    assert jnp.allclose(out_bf16.astype(jnp.float32), ref,
                        atol=5e-2, rtol=5e-2), "bf16 mismatch vs reference"

    # Exercise the padded-M path (tile size that does not divide N*H*W).
    out_pad = jax.block_until_ready(
        deup_cat_forward(x, prev, params, compute_dtype=jnp.float32, tm=40))
    assert jnp.allclose(out_pad, ref, atol=1e-4, rtol=1e-4), "padded-M mismatch"

    print("KERNEL_OK")
</pallas_src>

<mosaic_0001>
module attributes {stable_mosaic.version = 11 : i64} {
  func.func @deup_cat_kernel(%arg0: i32, %arg1: memref<128x8xf32, #tpu.memory_space<vmem>>, %arg2: memref<128x16xf32, #tpu.memory_space<vmem>>, %arg3: memref<8x16xf32, #tpu.memory_space<vmem>>, %arg4: memref<4x4xf32, #tpu.memory_space<vmem>>, %arg5: memref<1x16xf32, #tpu.memory_space<vmem>>, %arg6: memref<128x16xf32, #tpu.memory_space<vmem>>) attributes {dimension_semantics = [#tpu.dimension_semantics<parallel>], iteration_bounds = array<i64: 4>, scalar_prefetch = 0 : i64, scratch_operands = 0 : i64, tpu.core_type = #tpu.core_type<tc>, window_params = [{transform_indices = @transform_0, window_bounds = array<i64: 128, 8>}, {transform_indices = @transform_1, window_bounds = array<i64: 128, 16>}, {pipeline_mode = #tpu.pipeline_mode<synchronous>, transform_indices = @transform_2, window_bounds = array<i64: 8, 16>}, {pipeline_mode = #tpu.pipeline_mode<synchronous>, transform_indices = @transform_3, window_bounds = array<i64: 4, 4>}, {pipeline_mode = #tpu.pipeline_mode<synchronous>, transform_indices = @transform_4, window_bounds = array<i64: 1, 16>}, {transform_indices = @transform_5, window_bounds = array<i64: 128, 16>}]} {
    %c0 = arith.constant 0 : index
    %c0_0 = arith.constant 0 : index
    %0 = vector.load %arg1[%c0, %c0_0] : memref<128x8xf32, #tpu.memory_space<vmem>>, vector<128x8xf32>
    %c0_1 = arith.constant 0 : index
    %c0_2 = arith.constant 0 : index
    %1 = vector.load %arg3[%c0_1, %c0_2] : memref<8x16xf32, #tpu.memory_space<vmem>>, vector<8x16xf32>
    %cst = arith.constant dense<0.000000e+00> : vector<128x16xf32>
    %2 = tpu.matmul %0, %1, %cst {dimension_numbers = #tpu.dot_dimension_numbers<[1], [0], [0], [1], [0, 0, 1, 1], [], []>} : vector<128x8xf32>, vector<8x16xf32>, vector<128x16xf32> -> vector<128x16xf32>
    %c0_3 = arith.constant 0 : index
    %c0_4 = arith.constant 0 : index
    %3 = vector.load %arg5[%c0_3, %c0_4] : memref<1x16xf32, #tpu.memory_space<vmem>>, vector<1x16xf32>
    %4 = vector.broadcast %3 : vector<1x16xf32> to vector<128x16xf32>
    %5 = arith.addf %2, %4 : vector<128x16xf32>
    %c0_5 = arith.constant 0 : index
    %c0_6 = arith.constant 0 : index
    %6 = vector.load %arg4[%c0_5, %c0_6] : memref<4x4xf32, #tpu.memory_space<vmem>>, vector<4x4xf32>
    %c0_7 = arith.constant 0 : index
    %c0_8 = arith.constant 0 : index
    %7 = vector.load %arg2[%c0_7, %c0_8] : memref<128x16xf32, #tpu.memory_space<vmem>>, vector<128x16xf32>
    %8 = vector.extract_strided_slice %7 {offsets = [0, 0], sizes = [128, 4], strides = [1, 1]} : vector<128x16xf32> to vector<128x4xf32>
    %cst_9 = arith.constant dense<0.000000e+00> : vector<128x4xf32>
    %9 = tpu.matmul %8, %6, %cst_9 {dimension_numbers = #tpu.dot_dimension_numbers<[1], [0], [0], [1], [0, 0, 1, 1], [], []>} : vector<128x4xf32>, vector<4x4xf32>, vector<128x4xf32> -> vector<128x4xf32>
    %10 = vector.extract_strided_slice %5 {offsets = [0, 0], sizes = [128, 4], strides = [1, 1]} : vector<128x16xf32> to vector<128x4xf32>
    %11 = arith.addf %10, %9 : vector<128x4xf32>
    %c0_10 = arith.constant 0 : index
    %c0_11 = arith.constant 0 : index
    %12 = vector.load %arg6[%c0_10, %c0_11] : memref<128x16xf32, #tpu.memory_space<vmem>>, vector<128x4xf32>
    tpu.vector_store %arg6[%c0_10, %c0_11], %11 {strides = array<i32>} : memref<128x16xf32, #tpu.memory_space<vmem>>, vector<128x4xf32>,
    %13 = vector.extract_strided_slice %7 {offsets = [0, 4], sizes = [128, 4], strides = [1, 1]} : vector<128x16xf32> to vector<128x4xf32>
    %cst_12 = arith.constant dense<0.000000e+00> : vector<128x4xf32>
    %14 = tpu.matmul %13, %6, %cst_12 {dimension_numbers = #tpu.dot_dimension_numbers<[1], [0], [0], [1], [0, 0, 1, 1], [], []>} : vector<128x4xf32>, vector<4x4xf32>, vector<128x4xf32> -> vector<128x4xf32>
    %15 = vector.extract_strided_slice %5 {offsets = [0, 4], sizes = [128, 4], strides = [1, 1]} : vector<128x16xf32> to vector<128x4xf32>
    %16 = arith.addf %15, %14 : vector<128x4xf32>
    %c0_13 = arith.constant 0 : index
    %c4 = arith.constant 4 : index
    %17 = vector.load %arg6[%c0_13, %c4] : memref<128x16xf32, #tpu.memory_space<vmem>>, vector<128x4xf32>
    tpu.vector_store %arg6[%c0_13, %c4], %16 {strides = array<i32>} : memref<128x16xf32, #tpu.memory_space<vmem>>, vector<128x4xf32>,
    %18 = vector.extract_strided_slice %7 {offsets = [0, 8], sizes = [128, 4], strides = [1, 1]} : vector<128x16xf32> to vector<128x4xf32>
    %cst_14 = arith.constant dense<0.000000e+00> : vector<128x4xf32>
    %19 = tpu.matmul %18, %6, %cst_14 {dimension_numbers = #tpu.dot_dimension_numbers<[1], [0], [0], [1], [0, 0, 1, 1], [], []>} : vector<128x4xf32>, vector<4x4xf32>, vector<128x4xf32> -> vector<128x4xf32>
    %20 = vector.extract_strided_slice %5 {offsets = [0, 8], sizes = [128, 4], strides = [1, 1]} : vector<128x16xf32> to vector<128x4xf32>
    %21 = arith.addf %20, %19 : vector<128x4xf32>
    %c0_15 = arith.constant 0 : index
    %c8 = arith.constant 8 : index
    %22 = vector.load %arg6[%c0_15, %c8] : memref<128x16xf32, #tpu.memory_space<vmem>>, vector<128x4xf32>
    tpu.vector_store %arg6[%c0_15, %c8], %21 {strides = array<i32>} : memref<128x16xf32, #tpu.memory_space<vmem>>, vector<128x4xf32>,
    %23 = vector.extract_strided_slice %7 {offsets = [0, 12], sizes = [128, 4], strides = [1, 1]} : vector<128x16xf32> to vector<128x4xf32>
    %cst_16 = arith.constant dense<0.000000e+00> : vector<128x4xf32>
    %24 = tpu.matmul %23, %6, %cst_16 {dimension_numbers = #tpu.dot_dimension_numbers<[1], [0], [0], [1], [0, 0, 1, 1], [], []>} : vector<128x4xf32>, vector<4x4xf32>, vector<128x4xf32> -> vector<128x4xf32>
    %25 = vector.extract_strided_slice %5 {offsets = [0, 12], sizes = [128, 4], strides = [1, 1]} : vector<128x16xf32> to vector<128x4xf32>
    %26 = arith.addf %25, %24 : vector<128x4xf32>
    %c0_17 = arith.constant 0 : index
    %c12 = arith.constant 12 : index
    %27 = vector.load %arg6[%c0_17, %c12] : memref<128x16xf32, #tpu.memory_space<vmem>>, vector<128x4xf32>
    tpu.vector_store %arg6[%c0_17, %c12], %26 {strides = array<i32>} : memref<128x16xf32, #tpu.memory_space<vmem>>, vector<128x4xf32>,
    return
  }
  func.func @transform_0(%arg0: i32) -> (i32, i32) {
    %c0_i32 = arith.constant 0 : i32
    %c0_i32_0 = arith.constant 0 : i32
    return %arg0, %c0_i32 : i32, i32
  }
  func.func @transform_1(%arg0: i32) -> (i32, i32) {
    %c0_i32 = arith.constant 0 : i32
    %c0_i32_0 = arith.constant 0 : i32
    return %arg0, %c0_i32 : i32, i32
  }
  func.func @transform_2(%arg0: i32) -> (i32, i32) {
    %c0_i32 = arith.constant 0 : i32
    %c0_i32_0 = arith.constant 0 : i32
    %c0_i32_1 = arith.constant 0 : i32
    return %c0_i32, %c0_i32_0 : i32, i32
  }
  func.func @transform_3(%arg0: i32) -> (i32, i32) {
    %c0_i32 = arith.constant 0 : i32
    %c0_i32_0 = arith.constant 0 : i32
    %c0_i32_1 = arith.constant 0 : i32
    return %c0_i32, %c0_i32_0 : i32, i32
  }
  func.func @transform_4(%arg0: i32) -> (i32, i32) {
    %c0_i32 = arith.constant 0 : i32
    %c0_i32_0 = arith.constant 0 : i32
    %c0_i32_1 = arith.constant 0 : i32
    return %c0_i32, %c0_i32_0 : i32, i32
  }
  func.func @transform_5(%arg0: i32) -> (i32, i32) {
    %c0_i32 = arith.constant 0 : i32
    %c0_i32_0 = arith.constant 0 : i32
    return %arg0, %c0_i32 : i32, i32
  }
}

</mosaic_0001>

<bundles_post_ra>
// kernel: tpu_custom_call.1
= control target key start
LH: loop header
LB: loop body
LE: loop exit
PB: predicated region body
PF: predicated region fallthrough
CT: control target
= control target key end

     0   :  { %s1457_s18 = smov 0   ;;  %s1956_s0 = inlined_call_operand.vmem [shape: f32[512,8], index: 0, kind: input, shape index: {}]   ;;  %s1957_s1 = inlined_call_operand.vmem [shape: f32[512,16], index: 1, kind: input, shape index: {}]   ;;  %s1958_s2 = inlined_call_operand.vmem [shape: f32[8,16], index: 2, kind: input, shape index: {}]   ;;  %s1959_s3 = inlined_call_operand.vmem [shape: f32[4,4], index: 3, kind: input, shape index: {}]   ;;  %s1960_s4 = inlined_call_operand.vmem [shape: f32[1,16], index: 4, kind: input, shape index: {}]   ;;  %s1961_s5 = inlined_call_operand.vmem [shape: f32[512,16], index: 5, kind: output, shape index: {}]  }
   0x1 LB: > { %s1298_s19 = sadd.s32 4294967295, %s1419_s18   ;;  %p1302_p0 = scmp.ge.s32.totalorder %s1419_s18, 1  ;;  %s1419_s18 = sphi %s1457_s18, %s15_s18  }
   0x2   : > { %p199_p1 = scmp.lt.s32.totalorder %s1419_s18, 5 }
   0x4   : > { %p200_p2 = pnand %p1302_p0, %p199_p1 }
   0x5   : > { %s1303_s22 = sshll.u32 (!%p200_p2), %s1298_s19, 4  ;;  %s1421_s7 = smov (!%p200_p2), 124  }
   0x6   : > { %203 = sbr.rel (%p200_p2) target bundleno = 519 (0x207), region = 40  ;;  %p233_p3 = scmp.lt.s32.totalorder (!%p200_p2), %s1303_s22, 63 }
   0x7   : > { %s1422_s8 = smov (!%p200_p2), 120   ;;  %s1423_s9 = smov (!%p200_p2), 116  }
   0x8   : > { %s1424_s15 = smov (!%p200_p2), 4   ;;  %s1425_s16 = smov (!%p200_p2), 12  }
   0x9   : > { %s1426_s17 = smov (!%p200_p2), 8  }
   0xb   : > { %v266_v0 = vld [vmem:[%s1958_s2] sm:$0xff]  ;;  %vm451_vm0 = vcmask 1043456   ;;  %s1963_s22 = smov (!%p233_p3, %s1303_s22), 63  ;;  %vm271_vm1 = vcmask 64512   ;;  %vm402_vm2 = vcmask 31744   ;;  %vm761_vm3 = vcmask 64544  }
   0xc   : > { %1395 = vmatpush.msra.mxu1 %v266_v0  ;;  %v385_v1 = vld [vmem:[%s1959_s3] sm:$0xf]  ;;  %1396 = vmatpush.msra.mxu2 %v266_v0  ;;  %s1471_s25 = sshll.u32 %s1963_s22, 3  ;;  %vm987_vm4 = vcmask 97344   ;;  %vm1213_vm5 = vcmask 130144  }
   0xd   : > { %335 = vmatpush.msra.mxu0 %v266_v0  ;;  %1397 = vmatpush.msra.mxu3 %v266_v0  ;;  %s1477_s28 = scalar_lea.vmem %s1957_s1, %s1471_s25  ;;  %s1485_s6 = scalar_lea.vmem %s1956_s0, %s1471_s25 }
   0xe   : > { %1325 = vmatpush.msk.msrb.mxu1 %vm451_vm0, %v385_v1  ;;  %1342 = vmatpush.msk.msrb.mxu2 %vm451_vm0, %v385_v1  ;;  %v387_v2 = vld [vmem:[%s1477_s28 + $0x8] sm:$0xff]  ;;  %v386_v3 = vld [vmem:[%s1477_s28] sm:$0xff]  ;;  %v388_v6 = vld [vmem:[%s1477_s28 + $0x10] sm:$0xff]  ;;  %s1647_s14 = scalar_lea.vmem %s1961_s5, %s1471_s25 }
   0xf   : > { %1359 = vmatpush.msk.msrb.mxu3 %vm451_vm0, %v385_v1  ;;  %1376 = vmatpush.msk.msrb.mxu0 %vm451_vm0, %v385_v1  ;;  %v254_v4 = vld [vmem:[%s1485_s6 + $0x20] sm:$0xff]  ;;  %v255_v5 = vld [vmem:[%s1485_s6 + $0x28] sm:$0xff]  ;;  %v256_v7 = vld [vmem:[%s1485_s6 + $0x30] sm:$0xff] }
  0x10   : > { %554 = vrot.lane.b32.xlu1 %v387_v2, %s1421_s7  ;;  %552 = vrot.lane.b32.xlu0 %v386_v3, %s1421_s7  ;;  %v389_v8 = vld [vmem:[%s1477_s28 + $0x18] sm:$0xff]  ;;  %v390_v10 = vld [vmem:[%s1477_s28 + $0x20] sm:$0xff] }
  0x11   : > { %1313 = vmatmul.msk.f32.vlgmr.msra.gmra.mxu1 %vm271_vm1, %v254_v4  ;;  %780 = vrot.lane.b32.xlu2 %v387_v2, %s1422_s8  ;;  %v257_v9 = vld [vmem:[%s1485_s6 + $0x38] sm:$0xff]  ;;  %v391_v11 = vld [vmem:[%s1477_s28 + $0x28] sm:$0xff]  ;;  %v392_v12 = vld [vmem:[%s1477_s28 + $0x30] sm:$0xff] }
  0x12   : > { %v393_v13 = vld [vmem:[%s1477_s28 + $0x38] sm:$0xff]  ;;  %v258_v14 = vld [vmem:[%s1485_s6 + $0x40] sm:$0xff]  ;;  %v259_v17 = vld [vmem:[%s1485_s6 + $0x48] sm:$0xff] }
  0x13   : > { %1317 = vmatmul.msk.f32.vlgmr.msra.gmra.mxu2 %vm271_vm1, %v258_v14  ;;  %v394_v15 = vld [vmem:[%s1477_s28 + $0x40] sm:$0xff]  ;;  %v395_v19 = vld [vmem:[%s1477_s28 + $0x48] sm:$0xff]  ;;  %v260_v21 = vld [vmem:[%s1485_s6 + $0x50] sm:$0xff] }
  0x14   : > { %v250_v16 = vld [vmem:[%s1485_s6] sm:$0xff]  ;;  %v251_v20 = vld [vmem:[%s1485_s6 + $0x8] sm:$0xff]  ;;  %v396_v23 = vld [vmem:[%s1477_s28 + $0x50] sm:$0xff] }
  0x15   : > { %v262_v18 = vld [vmem:[%s1485_s6 + $0x60] sm:$0xff]  ;;  %1309 = vmatmul.msk.f32.vlgmr.msra.gmra.mxu0 %vm271_vm1, %v250_v16  ;;  %v263_v22 = vld [vmem:[%s1485_s6 + $0x68] sm:$0xff]  ;;  %v252_v24 = vld [vmem:[%s1485_s6 + $0x10] sm:$0xff] }
  0x16   : > { %1321 = vmatmul.msk.f32.vlgmr.msra.gmra.mxu3 %vm271_vm1, %v262_v18  ;;  %v261_v25 = vld [vmem:[%s1485_s6 + $0x58] sm:$0xff]  ;;  %v264_v26 = vld [vmem:[%s1485_s6 + $0x70] sm:$0xff]  ;;  %v398_v30 = vld [vmem:[%s1477_s28 + $0x60] sm:$0xff] }
  0x17   : > { %v397_v27 = vld [vmem:[%s1477_s28 + $0x58] sm:$0xff]  ;;  %v399_v32 = vld [vmem:[%s1477_s28 + $0x68] sm:$0xff]  ;;  %v400_v34 = vld [vmem:[%s1477_s28 + $0x70] sm:$0xff] }
  0x18   : > { %1004 = vrot.lane.b32.xlu1 %v386_v3, %s1423_s9  ;;  %778 = vrot.lane.b32.xlu0 %v386_v3, %s1422_s8  ;;  %v253_v28 = vld [vmem:[%s1485_s6 + $0x18] sm:$0xff] }
  0x19   : > { %1314 = vmatmul.msk.f32.gmra.mxu1 %vm271_vm1, %v255_v5  ;;  %556 = vrot.lane.b32.xlu2 %v388_v6, %s1421_s7  ;;  %v265_v29 = vld [vmem:[%s1485_s6 + $0x78] sm:$0xff] }
  0x1a   : > { %v401_v36 = vld [vmem:[%s1477_s28 + $0x78] sm:$0xff] }
  0x1b   : > { %1318 = vmatmul.msk.f32.gmra.mxu2 %vm271_vm1, %v259_v17 }
  0x1d   : > { %1310 = vmatmul.msk.f32.gmra.mxu0 %vm271_vm1, %v251_v20 }
  0x1e   : > { %1322 = vmatmul.msk.f32.gmra.mxu3 %vm271_vm1, %v263_v22 }
  0x20   : > { %1006 = vrot.lane.b32.xlu0 %v387_v2, %s1423_s9  ;;  %782 = vrot.lane.b32.xlu1 %v388_v6, %s1422_s8 }
  0x21   : > { %1315 = vmatmul.msk.f32.gmra.mxu1 %vm271_vm1, %v256_v7  ;;  %558 = vrot.lane.b32.xlu2 %v389_v8, %s1421_s7 }
  0x23   : > { %1319 = vmatmul.msk.f32.gmra.mxu2 %vm271_vm1, %v260_v21 }
  0x25   : > { %1311 = vmatmul.msk.f32.gmra.mxu0 %vm271_vm1, %v252_v24 }
  0x26   : > { %1323 = vmatmul.msk.f32.gmra.mxu3 %vm271_vm1, %v264_v26 }
  0x28   : > { %1008 = vrot.lane.b32.xlu0 %v388_v6, %s1423_s9  ;;  %784 = vrot.lane.b32.xlu1 %v389_v8, %s1422_s8 }
  0x29   : > { %1316 = vmatmul.msk.f32.gmra.mxu1 %vm271_vm1, %v257_v9  ;;  %560 = vrot.lane.b32.xlu2 %v390_v10, %s1421_s7 }
  0x2b   : > { %1320 = vmatmul.msk.f32.gmra.mxu2 %vm271_vm1, %v261_v25 }
  0x2d   : > { %1312 = vmatmul.msk.f32.gmra.mxu0 %vm271_vm1, %v253_v28 }
  0x2e   : > { %1324 = vmatmul.msk.f32.gmra.mxu3 %vm271_vm1, %v265_v29 }
  0x30   : > { %1010 = vrot.lane.b32.xlu0 %v389_v8, %s1423_s9  ;;  %786 = vrot.lane.b32.xlu1 %v390_v10, %s1422_s8 }
  0x31   : > { %1326 = vmatmul.msk.f32.vlgmr.msrb.gmra.mxu1 %vm402_vm2, %v386_v3  ;;  %562 = vrot.lane.b32.xlu2 %v391_v11, %s1421_s7 }
  0x38   : > { %1012 = vrot.lane.b32.xlu0 %v390_v10, %s1423_s9  ;;  %788 = vrot.lane.b32.xlu1 %v391_v11, %s1422_s8 }
  0x39   : > { %1327 = vmatmul.msk.f32.gmra.mxu1 %vm402_vm2, %v387_v2  ;;  %564 = vrot.lane.b32.xlu2 %v392_v12, %s1421_s7 }
  0x40   : > { %1014 = vrot.lane.b32.xlu0 %v391_v11, %s1423_s9  ;;  %790 = vrot.lane.b32.xlu1 %v392_v12, %s1422_s8 }
  0x41   : > { %1328 = vmatmul.msk.f32.gmra.mxu1 %vm402_vm2, %v388_v6  ;;  %566 = vrot.lane.b32.xlu2 %v393_v13, %s1421_s7  ;;  %v1631_v6 = vld [vmem:[%s1960_s4] ss:$0 sm:$0xff] }
  0x48   : > { %1016 = vrot.lane.b32.xlu0 %v392_v12, %s1423_s9  ;;  %792 = vrot.lane.b32.xlu1 %v393_v13, %s1422_s8 }
  0x49   : > { %1329 = vmatmul.msk.f32.gmra.mxu1 %vm402_vm2, %v389_v8  ;;  %568 = vrot.lane.b32.xlu2 %v394_v15, %s1421_s7 }
  0x50   : > { %1018 = vrot.lane.b32.xlu0 %v393_v13, %s1423_s9  ;;  %794 = vrot.lane.b32.xlu1 %v394_v15, %s1422_s8 }
  0x51   : > { %1330 = vmatmul.msk.f32.gmra.mxu1 %vm402_vm2, %v390_v10  ;;  %570 = vrot.lane.b32.xlu2 %v395_v19, %s1421_s7 }
  0x58   : > { %1020 = vrot.lane.b32.xlu0 %v394_v15, %s1423_s9  ;;  %796 = vrot.lane.b32.xlu1 %v395_v19, %s1422_s8 }
  0x59   : > { %1331 = vmatmul.msk.f32.gmra.mxu1 %vm402_vm2, %v391_v11  ;;  %572 = vrot.lane.b32.xlu2 %v396_v23, %s1421_s7 }
  0x60   : > { %1022 = vrot.lane.b32.xlu0 %v395_v19, %s1423_s9  ;;  %798 = vrot.lane.b32.xlu1 %v396_v23, %s1422_s8 }
  0x61   : > { %1332 = vmatmul.msk.f32.gmra.mxu1 %vm402_vm2, %v392_v12  ;;  %574 = vrot.lane.b32.xlu2 %v397_v27, %s1421_s7 }
  0x68   : > { %1024 = vrot.lane.b32.xlu0 %v396_v23, %s1423_s9  ;;  %800 = vrot.lane.b32.xlu1 %v397_v27, %s1422_s8 }
  0x69   : > { %1333 = vmatmul.msk.f32.gmra.mxu1 %vm402_vm2, %v393_v13  ;;  %576 = vrot.lane.b32.xlu2 %v398_v30, %s1421_s7 }
  0x6b   : > { %v781_v31 = vpop.permute.xlu2 %780 }
  0x70   : > { %1026 = vrot.lane.b32.xlu0 %v397_v27, %s1423_s9  ;;  %802 = vrot.lane.b32.xlu1 %v398_v30, %s1422_s8 }
  0x71   : > { %1334 = vmatmul.msk.f32.gmra.mxu1 %vm402_vm2, %v394_v15  ;;  %578 = vrot.lane.b32.xlu2 %v399_v32, %s1421_s7 }
  0x73   : > { %v557_v33 = vpop.permute.xlu2 %556 }
  0x78   : > { %1028 = vrot.lane.b32.xlu0 %v398_v30, %s1423_s9  ;;  %804 = vrot.lane.b32.xlu1 %v399_v32, %s1422_s8 }
  0x79   : > { %1335 = vmatmul.msk.f32.gmra.mxu1 %vm402_vm2, %v395_v19  ;;  %580 = vrot.lane.b32.xlu2 %v400_v34, %s1421_s7 }
  0x7b   : > { %v559_v35 = vpop.permute.xlu2 %558 }
  0x80   : > { %1030 = vrot.lane.b32.xlu0 %v399_v32, %s1423_s9  ;;  %806 = vrot.lane.b32.xlu1 %v400_v34, %s1422_s8 }
  0x81   : > { %1336 = vmatmul.msk.f32.gmra.mxu1 %vm402_vm2, %v396_v23  ;;  %582 = vrot.lane.b32.xlu2 %v401_v36, %s1421_s7 }
  0x82   : > { %v555_v37 = vpop.permute.xlu1 %554  ;;  %v553_v38 = vpop.permute.xlu0 %552 }
  0x83   : > { %1343 = vmatmul.msk.f32.vlgmr.msrb.gmra.mxu2 %vm402_vm2, %v553_v38  ;;  %v561_v39 = vpop.permute.xlu2 %560 }
  0x88   : > { %1032 = vrot.lane.b32.xlu0 %v400_v34, %s1423_s9  ;;  %808 = vrot.lane.b32.xlu1 %v401_v36, %s1422_s8 }
  0x89   : > { %1337 = vmatmul.msk.f32.gmra.mxu1 %vm402_vm2, %v397_v27  ;;  %1034 = vrot.lane.b32.xlu2 %v401_v36, %s1423_s9 }
  0x8a   : > { %v1005_v40 = vpop.permute.xlu1 %1004  ;;  %v779_v41 = vpop.permute.xlu0 %778 }
  0x8b   : > { %1344 = vmatmul.msk.f32.gmra.mxu2 %vm402_vm2, %v555_v37  ;;  %1360 = vmatmul.msk.f32.vlgmr.msrb.gmra.mxu3 %vm402_vm2, %v779_v41  ;;  %v563_v45 = vpop.permute.xlu2 %562 }
  0x8c   : > { %1377 = vmatmul.msk.f32.vlgmr.msrb.gmra.mxu0 %vm402_vm2, %v1005_v40 }
  0x8e   : > { %v349_v42 = vpop.f32.mrf.mxu1 }
  0x8f   : > { %v1637_v11 = vadd.f32 %v1631_v6, %v349_v42 }
  0x91   : > { %1338 = vmatmul.msk.f32.gmra.mxu1 %vm402_vm2, %v398_v30 }
  0x92   : > { %v1007_v43 = vpop.permute.xlu0 %1006  ;;  %v783_v44 = vpop.permute.xlu1 %782 }
  0x93   : > { %1361 = vmatmul.msk.f32.gmra.mxu3 %vm402_vm2, %v781_v31  ;;  %1345 = vmatmul.msk.f32.gmra.mxu2 %vm402_vm2, %v557_v33  ;;  %v565_v49 = vpop.permute.xlu2 %564  ;;  %v337_v7 = vpop.f32.mrf.mxu0 }
  0x94   : > { %1378 = vmatmul.msk.f32.gmra.mxu0 %vm402_vm2, %v1007_v43  ;;  %v1634_v10 = vadd.f32 %v1631_v6, %v337_v7 }
  0x96   : > { %v1601_v46 = vpop.f32.mrf.mxu1 }
  0x97   : > { %v1659_v20 = vadd.f32 %v1631_v6, %v1601_v46 }
  0x99   : > { %1339 = vmatmul.msk.f32.gmra.mxu1 %vm402_vm2, %v399_v32  ;;  %v361_v32 = vpop.f32.mrf.mxu2  ;;  %v373_v43 = vpop.f32.mrf.mxu3 }
  0x9a   : > { %v1009_v47 = vpop.permute.xlu0 %1008  ;;  %v785_v48 = vpop.permute.xlu1 %784  ;;  %v1703_v46 = vadd.f32 %v1631_v6, %v361_v32 }
  0x9b   : > { %1362 = vmatmul.msk.f32.gmra.mxu3 %vm402_vm2, %v783_v44  ;;  %1346 = vmatmul.msk.f32.gmra.mxu2 %vm402_vm2, %v559_v35  ;;  %v567_v54 = vpop.permute.xlu2 %566  ;;  %v340_v16 = vpop.f32.mrf.mxu0 }
  0x9c   : > { %1379 = vmatmul.msk.f32.gmra.mxu0 %vm402_vm2, %v1009_v47  ;;  %v1655_v19 = vadd.f32 %v1631_v6, %v340_v16 }
  0x9e   : > { %v1607_v50 = vpop.f32.mrf.mxu1 }
  0x9f   : > { %v1675_v29 = vadd.f32 %v1631_v6, %v1607_v50 }
  0xa1   : > { %1340 = vmatmul.msk.f32.gmra.mxu1 %vm402_vm2, %v400_v34  ;;  %v364_v44 = vpop.f32.mrf.mxu2 }
  0xa2   : > { %v1011_v51 = vpop.permute.xlu0 %1010  ;;  %v787_v52 = vpop.permute.xlu1 %786 }
  0xa3   : > { %1363 = vmatmul.msk.f32.gmra.mxu3 %vm402_vm2, %v785_v48  ;;  %1347 = vmatmul.msk.f32.gmra.mxu2 %vm402_vm2, %v561_v39  ;;  %v569_v58 = vpop.permute.xlu2 %568  ;;  %v343_v25 = vpop.f32.mrf.mxu0 }
  0xa4   : > { %1380 = vmatmul.msk.f32.gmra.mxu0 %vm402_vm2, %v1011_v51  ;;  %v1671_v28 = vadd.f32 %v1631_v6, %v343_v25  ;;  %v376_v51 = vpop.f32.mrf.mxu3 }
  0xa6   : > { %v1613_v53 = vpop.f32.mrf.mxu1 }
  0xa7   : > { %v1691_v38 = vadd.f32 %v1631_v6, %v1613_v53 }
  0xa9   : > { %1341 = vmatmul.msk.f32.gmra.mxu1 %vm402_vm2, %v401_v36 }
  0xaa   : > { %v1013_v55 = vpop.permute.xlu0 %1012  ;;  %v789_v56 = vpop.permute.xlu1 %788 }
  0xab   : > { %1364 = vmatmul.msk.f32.gmra.mxu3 %vm402_vm2, %v787_v52  ;;  %1348 = vmatmul.msk.f32.gmra.mxu2 %vm402_vm2, %v563_v45  ;;  %v571_v0 = vpop.permute.xlu2 %570  ;;  %v346_v34 = vpop.f32.mrf.mxu0 }
  0xac   : > { %1381 = vmatmul.msk.f32.gmra.mxu0 %vm402_vm2, %v1013_v55  ;;  %v1687_v37 = vadd.f32 %v1631_v6, %v346_v34  ;;  %v367_v52 = vpop.f32.mrf.mxu2 }
  0xae   : > { %v472_v57 = vpop.f32.mrf.mxu1 }
  0xaf   : > { %v520_v12 = vadd.f32 %v472_v57, %v1634_v10 }
  0xb1   : > { %536 = vst.msk [vmem:[%s1647_s14] sm:$0xff] %vm402_vm2, %v520_v12  ;;  %v1740_v12 = vadd.f32 %v1631_v6, %v373_v43 }
  0xb2   : > { %v1015_v59 = vpop.permute.xlu0 %1014  ;;  %v791_v60 = vpop.permute.xlu1 %790 }
  0xb3   : > { %1365 = vmatmul.msk.f32.gmra.mxu3 %vm402_vm2, %v789_v56  ;;  %1349 = vmatmul.msk.f32.gmra.mxu2 %vm402_vm2, %v565_v49  ;;  %v573_v4 = vpop.permute.xlu2 %572 }
  0xb4   : > { %1382 = vmatmul.msk.f32.gmra.mxu0 %vm402_vm2, %v1015_v59 }
  0xb6   : > { %v475_v61 = vpop.f32.mrf.mxu1 }
  0xb7   : > { %v521_v21 = vadd.f32 %v475_v61, %v1655_v19  ;;  %v379_v61 = vpop.f32.mrf.mxu3 }
  0xb9   : > { %537 = vst.msk [vmem:[%s1647_s14 + $0x8] sm:$0xff] %vm402_vm2, %v521_v21 }
  0xba   : > { %v1017_v62 = vpop.permute.xlu0 %1016  ;;  %v793_v63 = vpop.permute.xlu1 %792 }
  0xbb   : > { %1366 = vmatmul.msk.f32.gmra.mxu3 %vm402_vm2, %v791_v60  ;;  %1350 = vmatmul.msk.f32.gmra.mxu2 %vm402_vm2, %v567_v54  ;;  %v575_v15 = vpop.permute.xlu2 %574  ;;  %v1712_v54 = vadd.f32 %v1631_v6, %v364_v44  ;;  %v1721_v60 = vadd.f32 %v1631_v6, %v367_v52 }
  0xbc   : > { %1383 = vmatmul.msk.f32.gmra.mxu0 %vm402_vm2, %v1017_v62  ;;  %v370_v62 = vpop.f32.mrf.mxu2 }
  0xbe   : > { %v478_v1 = vpop.f32.mrf.mxu1 }
  0xbf   : > { %v522_v30 = vadd.f32 %v478_v1, %v1671_v28 }
  0xc1   : > { %538 = vst.msk [vmem:[%s1647_s14 + $0x10] sm:$0xff] %vm402_vm2, %v522_v30 }
  0xc2   : > { %v1019_v2 = vpop.permute.xlu0 %1018  ;;  %v795_v3 = vpop.permute.xlu1 %794 }
  0xc3   : > { %1367 = vmatmul.msk.f32.gmra.mxu3 %vm402_vm2, %v793_v63  ;;  %1351 = vmatmul.msk.f32.gmra.mxu2 %vm402_vm2, %v569_v58  ;;  %v577_v24 = vpop.permute.xlu2 %576 }
  0xc4   : > { %1384 = vmatmul.msk.f32.gmra.mxu0 %vm402_vm2, %v1019_v2 }
  0xc6   : > { %v481_v5 = vpop.f32.mrf.mxu1 }
  0xc7   : > { %v523_v40 = vadd.f32 %v481_v5, %v1687_v37 }
  0xc9   : > { %539 = vst.msk [vmem:[%s1647_s14 + $0x18] sm:$0xff] %vm402_vm2, %v523_v40 }
  0xca   : > { %v1021_v8 = vpop.permute.xlu0 %1020  ;;  %v797_v9 = vpop.permute.xlu1 %796 }
  0xcb   : > { %1368 = vmatmul.msk.f32.gmra.mxu3 %vm402_vm2, %v795_v3  ;;  %1352 = vmatmul.msk.f32.gmra.mxu2 %vm402_vm2, %v571_v0  ;;  %v579_v39 = vpop.permute.xlu2 %578  ;;  %v1730_v3 = vadd.f32 %v1631_v6, %v370_v62 }
  0xcc   : > { %1385 = vmatmul.msk.f32.gmra.mxu0 %vm402_vm2, %v1021_v8 }
  0xce   : > { %v484_v13 = vpop.f32.mrf.mxu1 }
  0xcf   : > { %v524_v14 = vadd.f32 %v484_v13, %v1637_v11 }
  0xd1   : > { %540 = vst.msk [vmem:[%s1647_s14 + $0x20] sm:$0xff] %vm402_vm2, %v524_v14 }
  0xd2   : > { %v1023_v17 = vpop.permute.xlu0 %1022  ;;  %v799_v18 = vpop.permute.xlu1 %798 }
  0xd3   : > { %1369 = vmatmul.msk.f32.gmra.mxu3 %vm402_vm2, %v797_v9  ;;  %1353 = vmatmul.msk.f32.gmra.mxu2 %vm402_vm2, %v573_v4  ;;  %v581_v48 = vpop.permute.xlu2 %580  ;;  %v382_v4 = vpop.f32.mrf.mxu3 }
  0xd4   : > { %1386 = vmatmul.msk.f32.gmra.mxu0 %vm402_vm2, %v1023_v17  ;;  %v1765_v34 = vadd.f32 %v1631_v6, %v382_v4 }
  0xd6   : > { %v487_v22 = vpop.f32.mrf.mxu1 }
  0xd7   : > { %v525_v23 = vadd.f32 %v487_v22, %v1659_v20 }
  0xd9   : > { %541 = vst.msk [vmem:[%s1647_s14 + $0x28] sm:$0xff] %vm402_vm2, %v525_v23 }
  0xda   : > { %v1025_v26 = vpop.permute.xlu0 %1024  ;;  %v801_v27 = vpop.permute.xlu1 %800 }
  0xdb   : > { %1370 = vmatmul.msk.f32.gmra.mxu3 %vm402_vm2, %v799_v18  ;;  %1354 = vmatmul.msk.f32.gmra.mxu2 %vm402_vm2, %v575_v15  ;;  %v583_v58 = vpop.permute.xlu2 %582  ;;  %v1748_v18 = vadd.f32 %v1631_v6, %v376_v51 }
  0xdc   : > { %1387 = vmatmul.msk.f32.gmra.mxu0 %vm402_vm2, %v1025_v26  ;;  %v1756_v26 = vadd.f32 %v1631_v6, %v379_v61 }
  0xde   : > { %v490_v31 = vpop.f32.mrf.mxu1 }
  0xdf   : > { %v526_v33 = vadd.f32 %v490_v31, %v1675_v29 }
  0xe1   : > { %542 = vst.msk [vmem:[%s1647_s14 + $0x30] sm:$0xff] %vm402_vm2, %v526_v33 }
  0xe2   : > { %v1027_v35 = vpop.permute.xlu0 %1026  ;;  %v803_v36 = vpop.permute.xlu1 %802 }
  0xe3   : > { %1371 = vmatmul.msk.f32.gmra.mxu3 %vm402_vm2, %v801_v27  ;;  %1355 = vmatmul.msk.f32.gmra.mxu2 %vm402_vm2, %v577_v24  ;;  %v1035_v2 = vpop.permute.xlu2 %1034 }
  0xe4   : > { %1388 = vmatmul.msk.f32.gmra.mxu0 %vm402_vm2, %v1027_v35 }
  0xe6   : > { %v493_v41 = vpop.f32.mrf.mxu1 }
  0xe7   : > { %v527_v42 = vadd.f32 %v493_v41, %v1691_v38 }
  0xe9   : > { %543 = vst.msk [vmem:[%s1647_s14 + $0x38] sm:$0xff] %vm402_vm2, %v527_v42 }
  0xea   : > { %v1029_v45 = vpop.permute.xlu0 %1028  ;;  %v805_v47 = vpop.permute.xlu1 %804 }
  0xeb   : > { %1372 = vmatmul.msk.f32.gmra.mxu3 %vm402_vm2, %v803_v36  ;;  %1356 = vmatmul.msk.f32.gmra.mxu2 %vm402_vm2, %v579_v39 }
  0xec   : > { %1389 = vmatmul.msk.f32.gmra.mxu0 %vm402_vm2, %v1029_v45 }
  0xee   : > { %v496_v49 = vpop.f32.mrf.mxu1 }
  0xef   : > { %v528_v50 = vadd.f32 %v496_v49, %v1703_v46 }
  0xf1   : > { %544 = vst.msk [vmem:[%s1647_s14 + $0x40] sm:$0xff] %vm402_vm2, %v528_v50 }
  0xf2   : > { %v1031_v53 = vpop.permute.xlu0 %1030  ;;  %v807_v56 = vpop.permute.xlu1 %806 }
  0xf3   : > { %1373 = vmatmul.msk.f32.gmra.mxu3 %vm402_vm2, %v805_v47  ;;  %1357 = vmatmul.msk.f32.gmra.mxu2 %vm402_vm2, %v581_v48 }
  0xf4   : > { %1390 = vmatmul.msk.f32.gmra.mxu0 %vm402_vm2, %v1031_v53 }
  0xf6   : > { %v499_v55 = vpop.f32.mrf.mxu1 }
  0xf7   : > { %v529_v57 = vadd.f32 %v499_v55, %v1712_v54 }
  0xf9   : > { %545 = vst.msk [vmem:[%s1647_s14 + $0x48] sm:$0xff] %vm402_vm2, %v529_v57 }
  0xfa   : > { %v1033_v59 = vpop.permute.xlu0 %1032  ;;  %v809_v1 = vpop.permute.xlu1 %808 }
  0xfb   : > { %1374 = vmatmul.msk.f32.gmra.mxu3 %vm402_vm2, %v807_v56  ;;  %1358 = vmatmul.msk.f32.gmra.mxu2 %vm402_vm2, %v583_v58 }
  0xfc   : > { %1391 = vmatmul.msk.f32.gmra.mxu0 %vm402_vm2, %v1033_v59 }
  0xfe   : > { %v502_v63 = vpop.f32.mrf.mxu1 }
  0xff   : > { %v530_v0 = vadd.f32 %v502_v63, %v1721_v60 }
 0x101   : > { %546 = vst.msk [vmem:[%s1647_s14 + $0x50] sm:$0xff] %vm402_vm2, %v530_v0 }
 0x103   : > { %1375 = vmatmul.msk.f32.gmra.mxu3 %vm402_vm2, %v809_v1 }
 0x104   : > { %1392 = vmatmul.msk.f32.gmra.mxu0 %vm402_vm2, %v1035_v2 }
 0x106   : > { %v505_v5 = vpop.f32.mrf.mxu1  ;;  %v633_v7 = vpop.f32.mrf.mxu2 }
 0x107   : > { %v531_v8 = vadd.f32 %v505_v5, %v1730_v3  ;;  %697 = vrot.lane.b32.xlu0 %v633_v7, %s1424_s15 }
 0x109   : > { %547 = vst.msk [vmem:[%s1647_s14 + $0x58] sm:$0xff] %vm402_vm2, %v531_v8  ;;  %v1085_v9 = vpop.f32.mrf.mxu0 }
 0x10a   : > { %1149 = vrot.lane.b32.xlu2 %v1085_v9, %s1425_s16 }
 0x10e   : > { %v508_v13 = vpop.f32.mrf.mxu1  ;;  %v636_v14 = vpop.f32.mrf.mxu2 }
 0x10f   : > { %v532_v15 = vadd.f32 %v508_v13, %v1740_v12  ;;  %v859_v16 = vpop.f32.mrf.mxu3 }
 0x110   : > { %923 = vrot.lane.b32.xlu1 %v859_v16, %s1426_s17 }
 0x111   : > { %548 = vst.msk [vmem:[%s1647_s14 + $0x60] sm:$0xff] %vm402_vm2, %v532_v15  ;;  %v1088_v17 = vpop.f32.mrf.mxu0 }
 0x112   : > { %1151 = vrot.lane.b32.xlu0 %v1088_v17, %s1425_s16 }
 0x116   : > { %v511_v21 = vpop.f32.mrf.mxu1  ;;  %v639_v22 = vpop.f32.mrf.mxu2 }
 0x117   : > { %v533_v23 = vadd.f32 %v511_v21, %v1748_v18  ;;  %v862_v24 = vpop.f32.mrf.mxu3 }
 0x118   : > { %699 = vrot.lane.b32.xlu1 %v636_v14, %s1424_s15  ;;  %925 = vrot.lane.b32.xlu2 %v862_v24, %s1426_s17 }
 0x119   : > { %549 = vst.msk [vmem:[%s1647_s14 + $0x68] sm:$0xff] %vm402_vm2, %v533_v23  ;;  %v1091_v25 = vpop.f32.mrf.mxu0 }
 0x11e   : > { %v514_v27 = vpop.f32.mrf.mxu1  ;;  %v642_v30 = vpop.f32.mrf.mxu2 }
 0x11f   : > { %v534_v31 = vadd.f32 %v514_v27, %v1756_v26  ;;  %v865_v32 = vpop.f32.mrf.mxu3 }
 0x120   : > { %701 = vrot.lane.b32.xlu2 %v639_v22, %s1424_s15  ;;  %927 = vrot.lane.b32.xlu0 %v865_v32, %s1426_s17 }
 0x121   : > { %550 = vst.msk [vmem:[%s1647_s14 + $0x70] sm:$0xff] %vm402_vm2, %v534_v31  ;;  %1153 = vrot.lane.b32.xlu1 %v1091_v25, %s1425_s16  ;;  %v1094_v33 = vpop.f32.mrf.mxu0 }
 0x126   : > { %v517_v35 = vpop.f32.mrf.mxu1  ;;  %v645_v36 = vpop.f32.mrf.mxu2 }
 0x127   : > { %v535_v39 = vadd.f32 %v517_v35, %v1765_v34  ;;  %v868_v40 = vpop.f32.mrf.mxu3 }
 0x128   : > { %703 = vrot.lane.b32.xlu0 %v642_v30, %s1424_s15  ;;  %1155 = vrot.lane.b32.xlu2 %v1094_v33, %s1425_s16 }
 0x129   : > { %551 = vst.msk [vmem:[%s1647_s14 + $0x78] sm:$0xff] %vm402_vm2, %v535_v39  ;;  %929 = vrot.lane.b32.xlu1 %v868_v40, %s1426_s17  ;;  %v1097_v41 = vpop.f32.mrf.mxu0 }
 0x12e   : > { %v648_v42 = vpop.f32.mrf.mxu2 }
 0x12f   : > { %v871_v43 = vpop.f32.mrf.mxu3 }
 0x130   : > { %931 = vrot.lane.b32.xlu2 %v871_v43, %s1426_s17  ;;  %1157 = vrot.lane.b32.xlu0 %v1097_v41, %s1425_s16 }
 0x131   : > { %705 = vrot.lane.b32.xlu1 %v645_v36, %s1424_s15  ;;  %v1100_v6 = vpop.f32.mrf.mxu0 }
 0x136   : > { %v651_v44 = vpop.f32.mrf.mxu2 }
 0x137   : > { %v874_v45 = vpop.f32.mrf.mxu3 }
 0x138   : > { %707 = vrot.lane.b32.xlu2 %v648_v42, %s1424_s15  ;;  %933 = vrot.lane.b32.xlu0 %v874_v45, %s1426_s17 }
 0x139   : > { %1159 = vrot.lane.b32.xlu1 %v1100_v6, %s1425_s16  ;;  %v1103_v47 = vpop.f32.mrf.mxu0 }
 0x13e   : > { %v654_v48 = vpop.f32.mrf.mxu2 }
 0x13f   : > { %v877_v49 = vpop.f32.mrf.mxu3 }
 0x140   : > { %709 = vrot.lane.b32.xlu0 %v651_v44, %s1424_s15  ;;  %1161 = vrot.lane.b32.xlu2 %v1103_v47, %s1425_s16 }
 0x141   : > { %935 = vrot.lane.b32.xlu1 %v877_v49, %s1426_s17  ;;  %v1106_v50 = vpop.f32.mrf.mxu0 }
 0x146   : > { %v657_v51 = vpop.f32.mrf.mxu2 }
 0x147   : > { %v880_v52 = vpop.f32.mrf.mxu3 }
 0x148   : > { %937 = vrot.lane.b32.xlu2 %v880_v52, %s1426_s17  ;;  %1163 = vrot.lane.b32.xlu0 %v1106_v50, %s1425_s16 }
 0x149   : > { %711 = vrot.lane.b32.xlu1 %v654_v48, %s1424_s15  ;;  %v1109_v53 = vpop.f32.mrf.mxu0 }
 0x14e   : > { %v660_v55 = vpop.f32.mrf.mxu2 }
 0x14f   : > { %v883_v56 = vpop.f32.mrf.mxu3 }
 0x150   : > { %713 = vrot.lane.b32.xlu2 %v657_v51, %s1424_s15  ;;  %939 = vrot.lane.b32.xlu0 %v883_v56, %s1426_s17 }
 0x151   : > { %1165 = vrot.lane.b32.xlu1 %v1109_v53, %s1425_s16  ;;  %v1112_v57 = vpop.f32.mrf.mxu0 }
 0x156   : > { %v663_v58 = vpop.f32.mrf.mxu2 }
 0x157   : > { %v886_v59 = vpop.f32.mrf.mxu3 }
 0x158   : > { %715 = vrot.lane.b32.xlu0 %v660_v55, %s1424_s15  ;;  %1167 = vrot.lane.b32.xlu2 %v1112_v57, %s1425_s16 }
 0x159   : > { %941 = vrot.lane.b32.xlu1 %v886_v59, %s1426_s17  ;;  %v1115_v61 = vpop.f32.mrf.mxu0 }
 0x15e   : > { %v666_v62 = vpop.f32.mrf.mxu2 }
 0x15f   : > { %v889_v63 = vpop.f32.mrf.mxu3 }
 0x160   : > { %943 = vrot.lane.b32.xlu2 %v889_v63, %s1426_s17  ;;  %1169 = vrot.lane.b32.xlu0 %v1115_v61, %s1425_s16 }
 0x161   : > { %717 = vrot.lane.b32.xlu1 %v663_v58, %s1424_s15  ;;  %v1118_v0 = vpop.f32.mrf.mxu0 }
 0x164   : > { %v1150_v5 = vpop.permute.xlu2 %1149 }
 0x165   : > { %v1197_v31 = vadd.f32 %v1150_v5, %v1634_v10 }
 0x166   : > { %v669_v2 = vpop.f32.mrf.mxu2 }
 0x167   : > { %v892_v1 = vpop.f32.mrf.mxu3 }
 0x168   : > { %719 = vrot.lane.b32.xlu2 %v666_v62, %s1424_s15  ;;  %945 = vrot.lane.b32.xlu0 %v892_v1, %s1426_s17 }
 0x169   : > { %1171 = vrot.lane.b32.xlu1 %v1118_v0, %s1425_s16  ;;  %v1121_v4 = vpop.f32.mrf.mxu0 }
 0x16e   : > { %v672_v8 = vpop.f32.mrf.mxu2 }
 0x16f   : > { %v895_v7 = vpop.f32.mrf.mxu3 }
 0x170   : > { %721 = vrot.lane.b32.xlu0 %v669_v2, %s1424_s15  ;;  %1173 = vrot.lane.b32.xlu2 %v1121_v4, %s1425_s16 }
 0x171   : > { %947 = vrot.lane.b32.xlu1 %v895_v7, %s1426_s17  ;;  %v1124_v13 = vpop.f32.mrf.mxu0 }
 0x172   : > { %v926_v9 = vpop.permute.xlu2 %925 }
 0x173   : > { %v972_v41 = vadd.f32 %v926_v9, %v1655_v19 }
 0x176   : > { %v675_v22 = vpop.f32.mrf.mxu2 }
 0x177   : > { %v898_v14 = vpop.f32.mrf.mxu3 }
 0x178   : > { %949 = vrot.lane.b32.xlu2 %v898_v14, %s1426_s17 }
 0x179   : > { %723 = vrot.lane.b32.xlu1 %v672_v8, %s1424_s15  ;;  %v698_v15 = vpop.permute.xlu0 %697  ;;  %v1127_v23 = vpop.f32.mrf.mxu0 }
 0x17a   : > { %v745_v16 = vadd.f32 %v698_v15, %v1634_v10  ;;  %v702_v17 = vpop.permute.xlu2 %701 }
 0x17b   : > { %v747_v21 = vadd.f32 %v702_v17, %v1671_v28 }
 0x17c   : > { %762 = vst.msk [vmem:[%s1647_s14] sm:$0xff] %vm761_vm3, %v745_v16 }
 0x17d   : > { %764 = vst.msk [vmem:[%s1647_s14 + $0x10] sm:$0xff] %vm761_vm3, %v747_v21 }
 0x17e   : > { %v678_v32 = vpop.f32.mrf.mxu2 }
 0x17f   : > { %v901_v24 = vpop.f32.mrf.mxu3 }
 0x180   : > { %951 = vrot.lane.b32.xlu0 %v901_v24, %s1426_s17  ;;  %725 = vrot.lane.b32.xlu2 %v675_v22, %s1424_s15 }
 0x181   : > { %v1130_v33 = vpop.f32.mrf.mxu0 }
 0x182   : > { %v924_v25 = vpop.permute.xlu1 %923  ;;  %v1156_v27 = vpop.permute.xlu2 %1155 }
 0x183   : > { %v971_v30 = vadd.f32 %v924_v25, %v1634_v10  ;;  %v1200_v53 = vadd.f32 %v1156_v27, %v1687_v37 }
 0x184   : > { %v1152_v36 = vpop.permute.xlu0 %1151 }
 0x185   : > { %988 = vst.msk [vmem:[%s1647_s14] sm:$0xff] %vm987_vm4, %v971_v30  ;;  %v1198_v42 = vadd.f32 %v1152_v36, %v1655_v19 }
 0x186   : > { %1214 = vst.msk [vmem:[%s1647_s14] sm:$0xff] %vm1213_vm5, %v1197_v31 }
 0x187   : > { %v904_v35 = vpop.f32.mrf.mxu3 }
 0x188   : > { %727 = vrot.lane.b32.xlu0 %v678_v32, %s1424_s15  ;;  %953 = vrot.lane.b32.xlu1 %v904_v35, %s1426_s17 }
 0x189   : > { %1179 = vrot.lane.b32.xlu2 %v1130_v33, %s1425_s16 }
 0x18a   : > { %v700_v39 = vpop.permute.xlu1 %699  ;;  %v932_v40 = vpop.permute.xlu2 %931 }
 0x18b   : > { %v746_v10 = vadd.f32 %v700_v39, %v1655_v19  ;;  %v975_v58 = vadd.f32 %v932_v40, %v1637_v11 }
 0x18d   : > { %763 = vst.msk [vmem:[%s1647_s14 + $0x8] sm:$0xff] %vm761_vm3, %v746_v10 }
 0x18e   : > { %989 = vst.msk [vmem:[%s1647_s14 + $0x8] sm:$0xff] %vm987_vm4, %v972_v41 }
 0x18f   : > { %1215 = vst.msk [vmem:[%s1647_s14 + $0x8] sm:$0xff] %vm1213_vm5, %v1198_v42 }
 0x190   : > { %1175 = vrot.lane.b32.xlu0 %v1124_v13, %s1425_s16  ;;  %1177 = vrot.lane.b32.xlu1 %v1127_v23, %s1425_s16 }
 0x192   : > { %v928_v43 = vpop.permute.xlu0 %927  ;;  %v708_v6 = vpop.permute.xlu2 %707 }
 0x193   : > { %v973_v44 = vadd.f32 %v928_v43, %v1671_v28  ;;  %v1154_v45 = vpop.permute.xlu1 %1153  ;;  %v750_v19 = vadd.f32 %v708_v6, %v1659_v20 }
 0x194   : > { %v1199_v47 = vadd.f32 %v1154_v45, %v1671_v28 }
 0x195   : > { %990 = vst.msk [vmem:[%s1647_s14 + $0x10] sm:$0xff] %vm987_vm4, %v973_v44 }
 0x196   : > { %1216 = vst.msk [vmem:[%s1647_s14 + $0x10] sm:$0xff] %vm1213_vm5, %v1199_v47 }
 0x197   : > { %767 = vst.msk [vmem:[%s1647_s14 + $0x28] sm:$0xff] %vm761_vm3, %v750_v19 }
 0x19a   : > { %v704_v48 = vpop.permute.xlu0 %703  ;;  %v1162_v49 = vpop.permute.xlu2 %1161 }
 0x19b   : > { %v748_v50 = vadd.f32 %v704_v48, %v1687_v37  ;;  %v930_v51 = vpop.permute.xlu1 %929  ;;  %v1203_v8 = vadd.f32 %v1162_v49, %v1675_v29 }
 0x19c   : > { %v974_v52 = vadd.f32 %v930_v51, %v1687_v37 }
 0x19d   : > { %765 = vst.msk [vmem:[%s1647_s14 + $0x18] sm:$0xff] %vm761_vm3, %v748_v50 }
 0x19e   : > { %991 = vst.msk [vmem:[%s1647_s14 + $0x18] sm:$0xff] %vm987_vm4, %v974_v52 }
 0x19f   : > { %1217 = vst.msk [vmem:[%s1647_s14 + $0x18] sm:$0xff] %vm1213_vm5, %v1200_v53 }
 0x1a2   : > { %v1158_v28 = vpop.permute.xlu0 %1157  ;;  %v938_v55 = vpop.permute.xlu2 %937 }
 0x1a3   : > { %v706_v56 = vpop.permute.xlu1 %705  ;;  %v1201_v37 = vadd.f32 %v1158_v28, %v1637_v11  ;;  %v978_v15 = vadd.f32 %v938_v55, %v1691_v38 }
 0x1a4   : > { %v749_v57 = vadd.f32 %v706_v56, %v1637_v11 }
 0x1a6   : > { %766 = vst.msk [vmem:[%s1647_s14 + $0x20] sm:$0xff] %vm761_vm3, %v749_v57 }
 0x1a7   : > { %992 = vst.msk [vmem:[%s1647_s14 + $0x20] sm:$0xff] %vm987_vm4, %v975_v58 }
 0x1a8   : > { %1218 = vst.msk [vmem:[%s1647_s14 + $0x20] sm:$0xff] %vm1213_vm5, %v1201_v37 }
 0x1aa   : > { %v934_v59 = vpop.permute.xlu0 %933  ;;  %v714_v61 = vpop.permute.xlu2 %713 }
 0x1ab   : > { %v976_v62 = vadd.f32 %v934_v59, %v1659_v20  ;;  %v1160_v63 = vpop.permute.xlu1 %1159  ;;  %v753_v0 = vadd.f32 %v714_v61, %v1703_v46 }
 0x1ac   : > { %v1202_v1 = vadd.f32 %v1160_v63, %v1659_v20 }
 0x1ad   : > { %993 = vst.msk [vmem:[%s1647_s14 + $0x28] sm:$0xff] %vm987_vm4, %v976_v62 }
 0x1ae   : > { %1219 = vst.msk [vmem:[%s1647_s14 + $0x28] sm:$0xff] %vm1213_vm5, %v1202_v1 }
 0x1af   : > { %770 = vst.msk [vmem:[%s1647_s14 + $0x40] sm:$0xff] %vm761_vm3, %v753_v0 }
 0x1b2   : > { %v710_v11 = vpop.permute.xlu0 %709  ;;  %v1168_v2 = vpop.permute.xlu2 %1167 }
 0x1b3   : > { %v751_v4 = vadd.f32 %v710_v11, %v1675_v29  ;;  %v936_v5 = vpop.permute.xlu1 %935  ;;  %v1206_v32 = vadd.f32 %v1168_v2, %v1712_v54 }
 0x1b4   : > { %v977_v7 = vadd.f32 %v936_v5, %v1675_v29 }
 0x1b5   : > { %768 = vst.msk [vmem:[%s1647_s14 + $0x30] sm:$0xff] %vm761_vm3, %v751_v4 }
 0x1b6   : > { %994 = vst.msk [vmem:[%s1647_s14 + $0x30] sm:$0xff] %vm987_vm4, %v977_v7 }
 0x1b7   : > { %1220 = vst.msk [vmem:[%s1647_s14 + $0x30] sm:$0xff] %vm1213_vm5, %v1203_v8 }
 0x1ba   : > { %v1164_v20 = vpop.permute.xlu0 %1163  ;;  %v944_v9 = vpop.permute.xlu2 %943 }
 0x1bb   : > { %v712_v13 = vpop.permute.xlu1 %711  ;;  %v1204_v29 = vadd.f32 %v1164_v20, %v1691_v38  ;;  %v981_v39 = vadd.f32 %v944_v9, %v1721_v60 }
 0x1bc   : > { %v752_v14 = vadd.f32 %v712_v13, %v1691_v38 }
 0x1be   : > { %769 = vst.msk [vmem:[%s1647_s14 + $0x38] sm:$0xff] %vm761_vm3, %v752_v14 }
 0x1bf   : > { %995 = vst.msk [vmem:[%s1647_s14 + $0x38] sm:$0xff] %vm987_vm4, %v978_v15 }
 0x1c0   : > { %1221 = vst.msk [vmem:[%s1647_s14 + $0x38] sm:$0xff] %vm1213_vm5, %v1204_v29 }
 0x1c2   : > { %v940_v16 = vpop.permute.xlu0 %939  ;;  %v720_v17 = vpop.permute.xlu2 %719 }
 0x1c3   : > { %v979_v21 = vadd.f32 %v940_v16, %v1703_v46  ;;  %v1166_v22 = vpop.permute.xlu1 %1165  ;;  %v756_v23 = vadd.f32 %v720_v17, %v1730_v3 }
 0x1c4   : > { %v1205_v24 = vadd.f32 %v1166_v22, %v1703_v46 }
 0x1c5   : > { %996 = vst.msk [vmem:[%s1647_s14 + $0x40] sm:$0xff] %vm987_vm4, %v979_v21 }
 0x1c6   : > { %1222 = vst.msk [vmem:[%s1647_s14 + $0x40] sm:$0xff] %vm1213_vm5, %v1205_v24 }
 0x1c7   : > { %773 = vst.msk [vmem:[%s1647_s14 + $0x58] sm:$0xff] %vm761_vm3, %v756_v23 }
 0x1ca   : > { %v716_v38 = vpop.permute.xlu0 %715  ;;  %v1174_v25 = vpop.permute.xlu2 %1173 }
 0x1cb   : > { %v754_v27 = vadd.f32 %v716_v38, %v1712_v54  ;;  %v942_v30 = vpop.permute.xlu1 %941  ;;  %v1209_v47 = vadd.f32 %v1174_v25, %v1740_v12 }
 0x1cc   : > { %v980_v31 = vadd.f32 %v942_v30, %v1712_v54 }
 0x1cd   : > { %771 = vst.msk [vmem:[%s1647_s14 + $0x48] sm:$0xff] %vm761_vm3, %v754_v27 }
 0x1ce   : > { %997 = vst.msk [vmem:[%s1647_s14 + $0x48] sm:$0xff] %vm987_vm4, %v980_v31 }
 0x1cf   : > { %1223 = vst.msk [vmem:[%s1647_s14 + $0x48] sm:$0xff] %vm1213_vm5, %v1206_v32 }
 0x1d2   : > { %v1170_v46 = vpop.permute.xlu0 %1169  ;;  %v950_v33 = vpop.permute.xlu2 %949 }
 0x1d3   : > { %v718_v35 = vpop.permute.xlu1 %717  ;;  %v1207_v54 = vadd.f32 %v1170_v46, %v1721_v60  ;;  %v984_v49 = vadd.f32 %v950_v33, %v1748_v18 }
 0x1d4   : > { %v755_v36 = vadd.f32 %v718_v35, %v1721_v60 }
 0x1d6   : > { %772 = vst.msk [vmem:[%s1647_s14 + $0x50] sm:$0xff] %vm761_vm3, %v755_v36 }
 0x1d7   : > { %998 = vst.msk [vmem:[%s1647_s14 + $0x50] sm:$0xff] %vm987_vm4, %v981_v39 }
 0x1d8   : > { %1224 = vst.msk [vmem:[%s1647_s14 + $0x50] sm:$0xff] %vm1213_vm5, %v1207_v54 }
 0x1da   : > { %v946_v40 = vpop.permute.xlu0 %945  ;;  %v726_v10 = vpop.permute.xlu2 %725 }
 0x1db   : > { %v982_v41 = vadd.f32 %v946_v40, %v1730_v3  ;;  %v1172_v42 = vpop.permute.xlu1 %1171  ;;  %v759_v43 = vadd.f32 %v726_v10, %v1756_v26 }
 0x1dc   : > { %v1208_v6 = vadd.f32 %v1172_v42, %v1730_v3 }
 0x1dd   : > { %999 = vst.msk [vmem:[%s1647_s14 + $0x58] sm:$0xff] %vm987_vm4, %v982_v41 }
 0x1de   : > { %1225 = vst.msk [vmem:[%s1647_s14 + $0x58] sm:$0xff] %vm1213_vm5, %v1208_v6 }
 0x1df   : > { %776 = vst.msk [vmem:[%s1647_s14 + $0x70] sm:$0xff] %vm761_vm3, %v759_v43 }
 0x1e2   : > { %v722_v60 = vpop.permute.xlu0 %721 }
 0x1e3   : > { %v757_v44 = vadd.f32 %v722_v60, %v1740_v12  ;;  %v948_v45 = vpop.permute.xlu1 %947  ;;  %v1180_v51 = vpop.permute.xlu2 %1179 }
 0x1e4   : > { %v983_v19 = vadd.f32 %v948_v45, %v1740_v12  ;;  %v1212_v56 = vadd.f32 %v1180_v51, %v1765_v34 }
 0x1e5   : > { %774 = vst.msk [vmem:[%s1647_s14 + $0x60] sm:$0xff] %vm761_vm3, %v757_v44 }
 0x1e6   : > { %1000 = vst.msk [vmem:[%s1647_s14 + $0x60] sm:$0xff] %vm987_vm4, %v983_v19 }
 0x1e7   : > { %1226 = vst.msk [vmem:[%s1647_s14 + $0x60] sm:$0xff] %vm1213_vm5, %v1209_v47 }
 0x1eb   : > { %v724_v3 = vpop.permute.xlu1 %723 }
 0x1ec   : > { %v758_v48 = vadd.f32 %v724_v3, %v1748_v18 }
 0x1ee   : > { %775 = vst.msk [vmem:[%s1647_s14 + $0x68] sm:$0xff] %vm761_vm3, %v758_v48 }
 0x1ef   : > { %1001 = vst.msk [vmem:[%s1647_s14 + $0x68] sm:$0xff] %vm987_vm4, %v984_v49 }
 0x1f2   : > { %v952_v50 = vpop.permute.xlu0 %951 }
 0x1f3   : > { %v985_v12 = vadd.f32 %v952_v50, %v1756_v26 }
 0x1f5   : > { %1002 = vst.msk [vmem:[%s1647_s14 + $0x70] sm:$0xff] %vm987_vm4, %v985_v12 }
 0x1fa   : > { %v728_v52 = vpop.permute.xlu0 %727  ;;  %v954_v53 = vpop.permute.xlu1 %953 }
 0x1fb   : > { %v760_v28 = vadd.f32 %v728_v52, %v1765_v34  ;;  %v986_v55 = vadd.f32 %v954_v53, %v1765_v34 }
 0x1fd   : > { %777 = vst.msk [vmem:[%s1647_s14 + $0x78] sm:$0xff] %vm761_vm3, %v760_v28 }
 0x1fe   : > { %1003 = vst.msk [vmem:[%s1647_s14 + $0x78] sm:$0xff] %vm987_vm4, %v986_v55 }
 0x1ff   : > { %1229 = vst.msk [vmem:[%s1647_s14 + $0x78] sm:$0xff] %vm1213_vm5, %v1212_v56 }
 0x202   : > { %v1176_v57 = vpop.permute.xlu0 %1175  ;;  %v1178_v58 = vpop.permute.xlu1 %1177 }
 0x203   : > { %v1210_v37 = vadd.f32 %v1176_v57, %v1748_v18  ;;  %v1211_v59 = vadd.f32 %v1178_v58, %v1756_v26 }
 0x205   : > { %1227 = vst.msk [vmem:[%s1647_s14 + $0x68] sm:$0xff] %vm1213_vm5, %v1210_v37 }
 0x206   : > { %1228 = vst.msk [vmem:[%s1647_s14 + $0x70] sm:$0xff] %vm1213_vm5, %v1211_v59 }
 0x207 PF: > { %s15_s18 = sadd.s32 1, %s1419_s18  }
 0x208   : > { %p12_p4 = scmp.ge.s32.totalorder %s15_s18, 6  }
 0x20a   :  { %14 = sbr.rel (!%p12_p4) target bundleno = 1 (0x1), region = 73 }

</bundles_post_ra>
